<compile_context>
chip_gen: v5e
topology: v5e:2x2
jax: 0.10.0
libtpu: 0.0.40
codegen_flags: <defaults>
</compile_context>

<pallas_src>
import functools

import jax
import jax.numpy as jnp
from jax import lax
from jax.experimental import pallas as pl
from jax.experimental.pallas import tpu as pltpu

NUM_GROUPS = 4
GN_EPS = 1e-5  # torch.nn.GroupNorm default


def _stage_kernel(s_ref, w_ref, m_ref, g_ref, b_ref, out_ref, *, apply_relu):
    """Fused stride-2 conv3x3 + GroupNorm (+ ReLU) for one batch element.

    s_ref  : (1, Ho, 2*(Wo+1)*4*Cin)   space-to-depth'd padded input, both row
                                       phases folded into lanes (lane-dense)
    w_ref  : (2*(Wo+1)*4*Cin, Wo*Cout) banded conv weight (single matmul)
    m_ref  : (Wo*Cout, Wo*Cout)        group-broadcast matrix pre-scaled by 1/N
    g_ref  : (1, Wo*Cout)              gamma tiled over output columns
    b_ref  : (1, Wo*Cout)              beta  tiled over output columns
    out_ref: (1, Ho, Wo*Cout)          lane-dense output
    """
    # ---- conv: one fat MXU matmul (all 9 taps folded into the banded weight) ----
    acc = jnp.dot(s_ref[0], w_ref[...],
                  preferred_element_type=jnp.float32)           # (Ho, Wo*Cout)

    # ---- GroupNorm: vectorized, exact two-pass, fused scale/shift ----
    csum = jnp.sum(acc, axis=0, keepdims=True)                  # (1, Wo*Cout)
    mean = jnp.dot(csum, m_ref[...],
                   preferred_element_type=jnp.float32)          # already /N
    d = acc - mean
    dsq = jnp.sum(d * d, axis=0, keepdims=True)
    var = jnp.dot(dsq, m_ref[...],
                  preferred_element_type=jnp.float32)           # already /N
    y = d * (g_ref[...] * lax.rsqrt(var + GN_EPS)) + b_ref[...]
    if apply_relu:
        y = jnp.maximum(y, 0.0)

    out_ref[0, :, :] = y


def _downsample_stage(x_nhwc, w_oihw, gamma, beta, *, apply_relu):
    """One (conv s2 + GN [+ReLU]) stage. x_nhwc: (B,H,W,Cin) -> (B,Ho,Wo,Cout)."""
    B, H, W, Cin = x_nhwc.shape
    Cout = w_oihw.shape[0]
    Ho = (H - 1) // 2 + 1
    Wo = (W - 1) // 2 + 1
    Kc = 4 * Cin
    L_in = (Wo + 1) * Kc
    L_out = Wo * Cout

    # -- activations: zero-pad + space-to-depth + lane-dense flatten (XLA side) --
    Hp, Wp = 2 * (Ho + 1), 2 * (Wo + 1)
    xp = jnp.pad(x_nhwc.astype(jnp.float32),
                 ((0, 0), (1, Hp - H - 1), (1, Wp - W - 1), (0, 0)))
    s = xp.reshape(B, Ho + 1, 2, Wo + 1, 2, Cin)
    s = jnp.transpose(s, (0, 1, 3, 2, 4, 5)).reshape(B, Ho + 1, L_in)
    # fold the two vertical phase blocks (rows I and I+1) into the lane axis so
    # the kernel needs no sublane-shifted slice and does a single matmul
    s_wide = jnp.concatenate([s[:, :Ho, :], s[:, 1:Ho + 1, :]], axis=-1)  # (B,Ho,2*L_in)

    # -- weights: OIHW -> 4 "phase" taps w2[A,Bq] -> banded (2*L_in, L_out) --
    wt = jnp.transpose(w_oihw, (2, 3, 1, 0)).astype(jnp.float32)    # HWIO (3,3,Cin,Cout)
    wt = jnp.pad(wt, ((0, 1), (0, 1), (0, 0), (0, 0)))              # (4,4,Cin,Cout)
    w2 = jnp.transpose(wt.reshape(2, 2, 2, 2, Cin, Cout),
                       (0, 2, 1, 3, 4, 5)).reshape(2, 2, Kc, Cout)  # [A,Bq,(a,bq,ci),co]
    e0 = jnp.eye(Wo + 1, Wo, k=0, dtype=jnp.float32)
    e1 = jnp.eye(Wo + 1, Wo, k=-1, dtype=jnp.float32)
    wbig = jnp.concatenate(
        [jnp.kron(e0, w2[0, 0]) + jnp.kron(e1, w2[0, 1]),
         jnp.kron(e0, w2[1, 0]) + jnp.kron(e1, w2[1, 1])], axis=0)  # (2*L_in, L_out)

    # -- GroupNorm helpers in the lane-dense (x*Cout + c) layout --
    cg = Cout // NUM_GROUPS
    n_per_group = float(Ho * Wo * cg)
    gblock = jnp.kron(jnp.eye(NUM_GROUPS, dtype=jnp.float32),
                      jnp.ones((cg, cg), jnp.float32))              # (Cout, Cout)
    mbig = jnp.kron(jnp.ones((Wo, Wo), jnp.float32), gblock) / n_per_group
    gamma_f = jnp.tile(gamma.astype(jnp.float32), Wo).reshape(1, L_out)
    beta_f = jnp.tile(beta.astype(jnp.float32), Wo).reshape(1, L_out)

    kern = functools.partial(_stage_kernel, apply_relu=apply_relu)

    out = pl.pallas_call(
        kern,
        out_shape=jax.ShapeDtypeStruct((B, Ho, L_out), jnp.float32),
        grid_spec=pltpu.PrefetchScalarGridSpec(
            num_scalar_prefetch=0,
            grid=(B,),
            in_specs=[
                pl.BlockSpec((1, Ho, 2 * L_in), lambda b: (b, 0, 0)),
                pl.BlockSpec((2 * L_in, L_out), lambda b: (0, 0)),
                pl.BlockSpec((L_out, L_out), lambda b: (0, 0)),
                pl.BlockSpec((1, L_out), lambda b: (0, 0)),
                pl.BlockSpec((1, L_out), lambda b: (0, 0)),
            ],
            out_specs=pl.BlockSpec((1, Ho, L_out), lambda b: (b, 0, 0)),
        ),
        compiler_params=pltpu.CompilerParams(
            dimension_semantics=("parallel",)),
    )(s_wide, wbig, mbig, gamma_f, beta_f)

    return out.reshape(B, Ho, Wo, Cout)


def downsample_forward(x_nchw, params):
    """Pallas implementation of DownsampleModule.forward. NCHW in / NCHW out.

    params: list of per-stage dicts {"conv_w": (Cout,Cin,3,3), "gn_w": (Cout,),
    "gn_b": (Cout,)} in the same order as DownsampleModule.net.
    """
    x = jnp.transpose(x_nchw, (0, 2, 3, 1)).astype(jnp.float32)   # NCHW -> NHWC
    n = len(params)
    for k, p in enumerate(params):
        x = _downsample_stage(x, p["conv_w"], p["gn_w"], p["gn_b"],
                              apply_relu=(k != n - 1))
    return jnp.transpose(x, (0, 3, 1, 2))                         # NHWC -> NCHW


downsample_forward_jit = jax.jit(downsample_forward)


# ----------------------- pure-JAX reference (for checking) -----------------------
def _gn_ref(x, gamma, beta):
    B, H, W, C = x.shape
    cg = C // NUM_GROUPS
    xg = x.reshape(B, H, W, NUM_GROUPS, cg)
    mean = jnp.mean(xg, axis=(1, 2, 4), keepdims=True)
    var = jnp.mean((xg - mean) ** 2, axis=(1, 2, 4), keepdims=True)
    xn = ((xg - mean) * lax.rsqrt(var + GN_EPS)).reshape(B, H, W, C)
    return xn * gamma.reshape(1, 1, 1, C) + beta.reshape(1, 1, 1, C)


def downsample_reference(x_nchw, params):
    x = jnp.transpose(x_nchw, (0, 2, 3, 1)).astype(jnp.float32)
    dn = ("NHWC", "HWIO", "NHWC")
    n = len(params)
    for k, p in enumerate(params):
        w = jnp.transpose(p["conv_w"], (2, 3, 1, 0)).astype(jnp.float32)
        x = lax.conv_general_dilated(x, w, (2, 2), ((1, 1), (1, 1)),
                                     dimension_numbers=dn)
        x = _gn_ref(x, p["gn_w"], p["gn_b"])
        if k != n - 1:
            x = jax.nn.relu(x)
    return jnp.transpose(x, (0, 3, 1, 2))


if __name__ == "__main__":
    key = jax.random.PRNGKey(0)
    # DownsampleModule(num_channels=(8,16,32), in_res=0, out_res=2):
    # two stride-2 stages: conv(8->8)+GN+ReLU, conv(8->32)+GN.
    num_channels = (8, 16, 32)
    in_res, out_res = 0, 2
    level_diff = out_res - in_res
    inp_chan, out_chan = num_channels[in_res], num_channels[out_res]
    B, H, W = 2, 16, 16

    ks = jax.random.split(key, 3 * level_diff + 1)
    params = []
    cin = inp_chan
    for k in range(level_diff):
        cout = out_chan if k == level_diff - 1 else inp_chan
        params.append({
            "conv_w": 0.1 * jax.random.normal(ks[3 * k], (cout, cin, 3, 3), jnp.float32),
            "gn_w": 1.0 + 0.1 * jax.random.normal(ks[3 * k + 1], (cout,), jnp.float32),
            "gn_b": 0.1 * jax.random.normal(ks[3 * k + 2], (cout,), jnp.float32),
        })
        cin = cout
    x = jax.random.normal(ks[-1], (B, inp_chan, H, W), jnp.float32)

    out = jax.block_until_ready(downsample_forward_jit(x, params))
    ref = jax.block_until_ready(downsample_reference(x, params))

    assert out.shape == (B, out_chan, H // 4, W // 4), out.shape
    err = float(jnp.max(jnp.abs(out - ref)))
    assert jnp.allclose(out, ref, atol=2e-4, rtol=2e-4), f"max abs err = {err}"
    print("KERNEL_OK")
</pallas_src>

<mosaic_0001>
module attributes {stable_mosaic.version = 11 : i64} {
  func.func @_stage_kernel(%arg0: i32, %arg1: memref<1x8x576xf32, #tpu.memory_space<vmem>>, %arg2: memref<576x64xf32, #tpu.memory_space<vmem>>, %arg3: memref<64x64xf32, #tpu.memory_space<vmem>>, %arg4: memref<1x64xf32, #tpu.memory_space<vmem>>, %arg5: memref<1x64xf32, #tpu.memory_space<vmem>>, %arg6: memref<1x8x64xf32, #tpu.memory_space<vmem>>) attributes {dimension_semantics = [#tpu.dimension_semantics<parallel>], iteration_bounds = array<i64: 2>, scalar_prefetch = 0 : i64, scratch_operands = 0 : i64, tpu.core_type = #tpu.core_type<tc>, window_params = [{transform_indices = @transform_0, window_bounds = array<i64: 1, 8, 576>}, {pipeline_mode = #tpu.pipeline_mode<synchronous>, transform_indices = @transform_1, window_bounds = array<i64: 576, 64>}, {pipeline_mode = #tpu.pipeline_mode<synchronous>, transform_indices = @transform_2, window_bounds = array<i64: 64, 64>}, {pipeline_mode = #tpu.pipeline_mode<synchronous>, transform_indices = @transform_3, window_bounds = array<i64: 1, 64>}, {pipeline_mode = #tpu.pipeline_mode<synchronous>, transform_indices = @transform_4, window_bounds = array<i64: 1, 64>}, {transform_indices = @transform_5, window_bounds = array<i64: 1, 8, 64>}]} {
    %c0 = arith.constant 0 : index
    %c0_0 = arith.constant 0 : index
    %c0_1 = arith.constant 0 : index
    %0 = vector.load %arg1[%c0, %c0_0, %c0_1] : memref<1x8x576xf32, #tpu.memory_space<vmem>>, vector<1x8x576xf32>
    %1 = vector.shape_cast %0 : vector<1x8x576xf32> to vector<8x576xf32>
    %c0_2 = arith.constant 0 : index
    %c0_3 = arith.constant 0 : index
    %2 = vector.load %arg2[%c0_2, %c0_3] : memref<576x64xf32, #tpu.memory_space<vmem>>, vector<576x64xf32>
    %cst = arith.constant dense<0.000000e+00> : vector<8x64xf32>
    %3 = tpu.matmul %1, %2, %cst {dimension_numbers = #tpu.dot_dimension_numbers<[1], [0], [0], [1], [0, 0, 1, 1], [], []>} : vector<8x576xf32>, vector<576x64xf32>, vector<8x64xf32> -> vector<8x64xf32>
    %cst_4 = arith.constant dense<0.000000e+00> : vector<64xf32>
    %4 = vector.multi_reduction <add>, %3, %cst_4 [0] : vector<8x64xf32> to vector<64xf32>
    %5 = vector.shape_cast %4 : vector<64xf32> to vector<1x64xf32>
    %c0_5 = arith.constant 0 : index
    %c0_6 = arith.constant 0 : index
    %6 = vector.load %arg3[%c0_5, %c0_6] : memref<64x64xf32, #tpu.memory_space<vmem>>, vector<64x64xf32>
    %cst_7 = arith.constant dense<0.000000e+00> : vector<1x64xf32>
    %7 = tpu.matmul %5, %6, %cst_7 {dimension_numbers = #tpu.dot_dimension_numbers<[1], [0], [0], [1], [0, 0, 1, 1], [], []>} : vector<1x64xf32>, vector<64x64xf32>, vector<1x64xf32> -> vector<1x64xf32>
    %8 = vector.broadcast %7 : vector<1x64xf32> to vector<8x64xf32>
    %9 = arith.subf %3, %8 : vector<8x64xf32>
    %10 = arith.mulf %9, %9 : vector<8x64xf32>
    %cst_8 = arith.constant dense<0.000000e+00> : vector<64xf32>
    %11 = vector.multi_reduction <add>, %10, %cst_8 [0] : vector<8x64xf32> to vector<64xf32>
    %12 = vector.shape_cast %11 : vector<64xf32> to vector<1x64xf32>
    %c0_9 = arith.constant 0 : index
    %c0_10 = arith.constant 0 : index
    %13 = vector.load %arg3[%c0_9, %c0_10] : memref<64x64xf32, #tpu.memory_space<vmem>>, vector<64x64xf32>
    %cst_11 = arith.constant dense<0.000000e+00> : vector<1x64xf32>
    %14 = tpu.matmul %12, %13, %cst_11 {dimension_numbers = #tpu.dot_dimension_numbers<[1], [0], [0], [1], [0, 0, 1, 1], [], []>} : vector<1x64xf32>, vector<64x64xf32>, vector<1x64xf32> -> vector<1x64xf32>
    %c0_12 = arith.constant 0 : index
    %c0_13 = arith.constant 0 : index
    %15 = vector.load %arg4[%c0_12, %c0_13] : memref<1x64xf32, #tpu.memory_space<vmem>>, vector<1x64xf32>
    %cst_14 = arith.constant 9.99999974E-6 : f32
    %16 = vector.broadcast %cst_14 : f32 to vector<1x64xf32>
    %17 = arith.addf %14, %16 : vector<1x64xf32>
    %18 = math.rsqrt %17 : vector<1x64xf32>
    %19 = arith.mulf %15, %18 : vector<1x64xf32>
    %20 = vector.broadcast %19 : vector<1x64xf32> to vector<8x64xf32>
    %21 = arith.mulf %9, %20 : vector<8x64xf32>
    %c0_15 = arith.constant 0 : index
    %c0_16 = arith.constant 0 : index
    %22 = vector.load %arg5[%c0_15, %c0_16] : memref<1x64xf32, #tpu.memory_space<vmem>>, vector<1x64xf32>
    %23 = vector.broadcast %22 : vector<1x64xf32> to vector<8x64xf32>
    %24 = arith.addf %21, %23 : vector<8x64xf32>
    %cst_17 = arith.constant 0.000000e+00 : f32
    %25 = vector.broadcast %cst_17 : f32 to vector<8x64xf32>
    %26 = arith.maximumf %24, %25 : vector<8x64xf32>
    %c0_18 = arith.constant 0 : index
    %c0_19 = arith.constant 0 : index
    %c0_20 = arith.constant 0 : index
    %27 = vector.load %arg6[%c0_18, %c0_19, %c0_20] : memref<1x8x64xf32, #tpu.memory_space<vmem>>, vector<1x8x64xf32>
    %28 = vector.shape_cast %27 : vector<1x8x64xf32> to vector<8x64xf32>
    %29 = vector.shape_cast %26 : vector<8x64xf32> to vector<1x8x64xf32>
    tpu.vector_store %arg6[%c0_18, %c0_19, %c0_20], %29 {strides = array<i32>} : memref<1x8x64xf32, #tpu.memory_space<vmem>>, vector<1x8x64xf32>,
    return
  }
  func.func @transform_0(%arg0: i32) -> (i32, i32, i32) {
    %c0_i32 = arith.constant 0 : i32
    %c0_i32_0 = arith.constant 0 : i32
    %c0_i32_1 = arith.constant 0 : i32
    return %arg0, %c0_i32, %c0_i32_0 : i32, i32, i32
  }
  func.func @transform_1(%arg0: i32) -> (i32, i32) {
    %c0_i32 = arith.constant 0 : i32
    %c0_i32_0 = arith.constant 0 : i32
    %c0_i32_1 = arith.constant 0 : i32
    return %c0_i32, %c0_i32_0 : i32, i32
  }
  func.func @transform_2(%arg0: i32) -> (i32, i32) {
    %c0_i32 = arith.constant 0 : i32
    %c0_i32_0 = arith.constant 0 : i32
    %c0_i32_1 = arith.constant 0 : i32
    return %c0_i32, %c0_i32_0 : i32, i32
  }
  func.func @transform_3(%arg0: i32) -> (i32, i32) {
    %c0_i32 = arith.constant 0 : i32
    %c0_i32_0 = arith.constant 0 : i32
    %c0_i32_1 = arith.constant 0 : i32
    return %c0_i32, %c0_i32_0 : i32, i32
  }
  func.func @transform_4(%arg0: i32) -> (i32, i32) {
    %c0_i32 = arith.constant 0 : i32
    %c0_i32_0 = arith.constant 0 : i32
    %c0_i32_1 = arith.constant 0 : i32
    return %c0_i32, %c0_i32_0 : i32, i32
  }
  func.func @transform_5(%arg0: i32) -> (i32, i32, i32) {
    %c0_i32 = arith.constant 0 : i32
    %c0_i32_0 = arith.constant 0 : i32
    %c0_i32_1 = arith.constant 0 : i32
    return %arg0, %c0_i32, %c0_i32_0 : i32, i32, i32
  }
}

module attributes {stable_mosaic.version = 11 : i64} {
  func.func @_stage_kernel(%arg0: i32, %arg1: memref<1x4x320xf32, #tpu.memory_space<vmem>>, %arg2: memref<320x128xf32, #tpu.memory_space<vmem>>, %arg3: memref<128x128xf32, #tpu.memory_space<vmem>>, %arg4: memref<1x128xf32, #tpu.memory_space<vmem>>, %arg5: memref<1x128xf32, #tpu.memory_space<vmem>>, %arg6: memref<1x4x128xf32, #tpu.memory_space<vmem>>) attributes {dimension_semantics = [#tpu.dimension_semantics<parallel>], iteration_bounds = array<i64: 2>, scalar_prefetch = 0 : i64, scratch_operands = 0 : i64, tpu.core_type = #tpu.core_type<tc>, window_params = [{transform_indices = @transform_0, window_bounds = array<i64: 1, 4, 320>}, {pipeline_mode = #tpu.pipeline_mode<synchronous>, transform_indices = @transform_1, window_bounds = array<i64: 320, 128>}, {pipeline_mode = #tpu.pipeline_mode<synchronous>, transform_indices = @transform_2, window_bounds = array<i64: 128, 128>}, {pipeline_mode = #tpu.pipeline_mode<synchronous>, transform_indices = @transform_3, window_bounds = array<i64: 1, 128>}, {pipeline_mode = #tpu.pipeline_mode<synchronous>, transform_indices = @transform_4, window_bounds = array<i64: 1, 128>}, {transform_indices = @transform_5, window_bounds = array<i64: 1, 4, 128>}]} {
    %c0 = arith.constant 0 : index
    %c0_0 = arith.constant 0 : index
    %c0_1 = arith.constant 0 : index
    %0 = vector.load %arg1[%c0, %c0_0, %c0_1] : memref<1x4x320xf32, #tpu.memory_space<vmem>>, vector<1x4x320xf32>
    %1 = vector.shape_cast %0 : vector<1x4x320xf32> to vector<4x320xf32>
    %c0_2 = arith.constant 0 : index
    %c0_3 = arith.constant 0 : index
    %2 = vector.load %arg2[%c0_2, %c0_3] : memref<320x128xf32, #tpu.memory_space<vmem>>, vector<320x128xf32>
    %cst = arith.constant dense<0.000000e+00> : vector<4x128xf32>
    %3 = tpu.matmul %1, %2, %cst {dimension_numbers = #tpu.dot_dimension_numbers<[1], [0], [0], [1], [0, 0, 1, 1], [], []>} : vector<4x320xf32>, vector<320x128xf32>, vector<4x128xf32> -> vector<4x128xf32>
    %cst_4 = arith.constant dense<0.000000e+00> : vector<128xf32>
    %4 = vector.multi_reduction <add>, %3, %cst_4 [0] : vector<4x128xf32> to vector<128xf32>
    %5 = vector.shape_cast %4 : vector<128xf32> to vector<1x128xf32>
    %c0_5 = arith.constant 0 : index
    %c0_6 = arith.constant 0 : index
    %6 = vector.load %arg3[%c0_5, %c0_6] : memref<128x128xf32, #tpu.memory_space<vmem>>, vector<128x128xf32>
    %cst_7 = arith.constant dense<0.000000e+00> : vector<1x128xf32>
    %7 = tpu.matmul %5, %6, %cst_7 {dimension_numbers = #tpu.dot_dimension_numbers<[1], [0], [0], [1], [0, 0, 1, 1], [], []>} : vector<1x128xf32>, vector<128x128xf32>, vector<1x128xf32> -> vector<1x128xf32>
    %8 = vector.broadcast %7 : vector<1x128xf32> to vector<4x128xf32>
    %9 = arith.subf %3, %8 : vector<4x128xf32>
    %10 = arith.mulf %9, %9 : vector<4x128xf32>
    %cst_8 = arith.constant dense<0.000000e+00> : vector<128xf32>
    %11 = vector.multi_reduction <add>, %10, %cst_8 [0] : vector<4x128xf32> to vector<128xf32>
    %12 = vector.shape_cast %11 : vector<128xf32> to vector<1x128xf32>
    %c0_9 = arith.constant 0 : index
    %c0_10 = arith.constant 0 : index
    %13 = vector.load %arg3[%c0_9, %c0_10] : memref<128x128xf32, #tpu.memory_space<vmem>>, vector<128x128xf32>
    %cst_11 = arith.constant dense<0.000000e+00> : vector<1x128xf32>
    %14 = tpu.matmul %12, %13, %cst_11 {dimension_numbers = #tpu.dot_dimension_numbers<[1], [0], [0], [1], [0, 0, 1, 1], [], []>} : vector<1x128xf32>, vector<128x128xf32>, vector<1x128xf32> -> vector<1x128xf32>
    %c0_12 = arith.constant 0 : index
    %c0_13 = arith.constant 0 : index
    %15 = vector.load %arg4[%c0_12, %c0_13] : memref<1x128xf32, #tpu.memory_space<vmem>>, vector<1x128xf32>
    %cst_14 = arith.constant 9.99999974E-6 : f32
    %16 = vector.broadcast %cst_14 : f32 to vector<1x128xf32>
    %17 = arith.addf %14, %16 : vector<1x128xf32>
    %18 = math.rsqrt %17 : vector<1x128xf32>
    %19 = arith.mulf %15, %18 : vector<1x128xf32>
    %20 = vector.broadcast %19 : vector<1x128xf32> to vector<4x128xf32>
    %21 = arith.mulf %9, %20 : vector<4x128xf32>
    %c0_15 = arith.constant 0 : index
    %c0_16 = arith.constant 0 : index
    %22 = vector.load %arg5[%c0_15, %c0_16] : memref<1x128xf32, #tpu.memory_space<vmem>>, vector<1x128xf32>
    %23 = vector.broadcast %22 : vector<1x128xf32> to vector<4x128xf32>
    %24 = arith.addf %21, %23 : vector<4x128xf32>
    %c0_17 = arith.constant 0 : index
    %c0_18 = arith.constant 0 : index
    %c0_19 = arith.constant 0 : index
    %25 = vector.load %arg6[%c0_17, %c0_18, %c0_19] : memref<1x4x128xf32, #tpu.memory_space<vmem>>, vector<1x4x128xf32>
    %26 = vector.shape_cast %25 : vector<1x4x128xf32> to vector<4x128xf32>
    %27 = vector.shape_cast %24 : vector<4x128xf32> to vector<1x4x128xf32>
    tpu.vector_store %arg6[%c0_17, %c0_18, %c0_19], %27 {strides = array<i32>} : memref<1x4x128xf32, #tpu.memory_space<vmem>>, vector<1x4x128xf32>,
    return
  }
  func.func @transform_0(%arg0: i32) -> (i32, i32, i32) {
    %c0_i32 = arith.constant 0 : i32
    %c0_i32_0 = arith.constant 0 : i32
    %c0_i32_1 = arith.constant 0 : i32
    return %arg0, %c0_i32, %c0_i32_0 : i32, i32, i32
  }
  func.func @transform_1(%arg0: i32) -> (i32, i32) {
    %c0_i32 = arith.constant 0 : i32
    %c0_i32_0 = arith.constant 0 : i32
    %c0_i32_1 = arith.constant 0 : i32
    return %c0_i32, %c0_i32_0 : i32, i32
  }
  func.func @transform_2(%arg0: i32) -> (i32, i32) {
    %c0_i32 = arith.constant 0 : i32
    %c0_i32_0 = arith.constant 0 : i32
    %c0_i32_1 = arith.constant 0 : i32
    return %c0_i32, %c0_i32_0 : i32, i32
  }
  func.func @transform_3(%arg0: i32) -> (i32, i32) {
    %c0_i32 = arith.constant 0 : i32
    %c0_i32_0 = arith.constant 0 : i32
    %c0_i32_1 = arith.constant 0 : i32
    return %c0_i32, %c0_i32_0 : i32, i32
  }
  func.func @transform_4(%arg0: i32) -> (i32, i32) {
    %c0_i32 = arith.constant 0 : i32
    %c0_i32_0 = arith.constant 0 : i32
    %c0_i32_1 = arith.constant 0 : i32
    return %c0_i32, %c0_i32_0 : i32, i32
  }
  func.func @transform_5(%arg0: i32) -> (i32, i32, i32) {
    %c0_i32 = arith.constant 0 : i32
    %c0_i32_0 = arith.constant 0 : i32
    %c0_i32_1 = arith.constant 0 : i32
    return %arg0, %c0_i32, %c0_i32_0 : i32, i32, i32
  }
}

</mosaic_0001>

<bundles_post_ra>
// kernel: tile.23
= control target key start
LH: loop header
LB: loop body
LE: loop exit
PB: predicated region body
PF: predicated region fallthrough
CT: control target
= control target key end

     0   :  { %s22_s0 = inlined_call_operand.vmem [shape: f32[8], index: 0, kind: input, shape index: {}]   ;;  %s23_s1 = inlined_call_operand.vmem [shape: f32[8,8], index: 1, kind: output, shape index: {}]  }
   0x1   :  { %v4_v0 = vld [vmem:[%s22_s0] ss:$0 sm:$0xff] }
   0x2   :  { %5 = vst [vmem:[%s23_s1] sm:$0xff] %v4_v0 }

// kernel: tile.24
= control target key start
LH: loop header
LB: loop body
LE: loop exit
PB: predicated region body
PF: predicated region fallthrough
CT: control target
= control target key end

     0   :  { %s67_s10 = smov 56   ;;  %s68_s11 = smov 40   ;;  %vm3_vm0 = vcmask 64512   ;;  %vm9_vm1 = vcmask 523712   ;;  %vm15_vm2 = vcmask 458112   ;;  %vm21_vm3 = vcmask 392512   ;;  %s111_s0 = inlined_call_operand.vmem [shape: f32[8,8], index: 0, kind: input, shape index: {}]   ;;  %s112_s1 = inlined_call_operand.vmem [shape: f32[1,64], index: 1, kind: output, shape index: {}]  }
   0x1   :  { %v53_v0 = vld [vmem:[%s111_s0 + $0x7] sm:$0x1]   ;;  %v55_v1 = vld [vmem:[%s111_s0 + $0x5] sm:$0x1]   ;;  %v57_v2 = vld [vmem:[%s111_s0 + $0x3] sm:$0x1]  }
   0x2   :  { %7 = vrot.lane.b32.xlu0 %v53_v0, %s67_s10  ;;  %19 = vrot.lane.b32.xlu1 %v55_v1, %s68_s11  ;;  %s69_s14 = smov 24   ;;  %v54_v3 = vld [vmem:[%s111_s0 + $0x6] sm:$0x1]   ;;  %v56_v4 = vld [vmem:[%s111_s0 + $0x4] sm:$0x1]   ;;  %s70_s21 = smov 48  }
   0x3   :  { %31 = vrot.lane.b32.xlu2 %v57_v2, %s69_s14  ;;  %v58_v5 = vld [vmem:[%s111_s0 + $0x2] sm:$0x1]   ;;  %s71_s22 = smov 32   ;;  %s72_s23 = smov 16   ;;  %v59_v6 = vld [vmem:[%s111_s0 + $0x1] sm:$0x1]  }
   0x4   :  { %s73_s26 = smov 8   ;;  %v2_v7 = vld [vmem:[%s111_s0] sm:$0x1]   ;;  %vm27_vm4 = vcmask 326912   ;;  %vm33_vm5 = vcmask 261312   ;;  %vm39_vm6 = vcmask 195712  }
   0x5   :  { %4 = vst.msk [vmem:[#allocation0] sm:$0x1] %vm3_vm0, %v2_v7   ;;  %vm45_vm7 = vcmask 130112  }
   0xa   :  { %13 = vrot.lane.b32.xlu0 %v54_v3, %s70_s21  ;;  %25 = vrot.lane.b32.xlu1 %v56_v4, %s71_s22 }
   0xb   :  { %37 = vrot.lane.b32.xlu2 %v58_v5, %s72_s23 }
  0x12   :  { %43 = vrot.lane.b32.xlu0 %v59_v6, %s73_s26 }
  0x5d   :  { %v32_v8 = vpop.permute.xlu2 %31  }
  0x65   :  { %v38_v9 = vpop.permute.xlu2 %37  }
  0x74   :  { %v8_v10 = vpop.permute.xlu0 %7   ;;  %v20_v11 = vpop.permute.xlu1 %19  }
  0x75   :  { %10 = vst.msk [vmem:[#allocation0] sm:$0x1] %vm9_vm1, %v8_v10  }
  0x7c   :  { %v14_v12 = vpop.permute.xlu0 %13   ;;  %v26_v13 = vpop.permute.xlu1 %25  }
  0x7d   :  { %16 = vst.msk [vmem:[#allocation0] sm:$0x1] %vm15_vm2, %v14_v12  }
  0x7e   :  { %22 = vst.msk [vmem:[#allocation0] sm:$0x1] %vm21_vm3, %v20_v11  }
  0x7f   :  { %28 = vst.msk [vmem:[#allocation0] sm:$0x1] %vm27_vm4, %v26_v13  }
  0x80   :  { %34 = vst.msk [vmem:[#allocation0] sm:$0x1] %vm33_vm5, %v32_v8  }
  0x81   :  { %40 = vst.msk [vmem:[#allocation0] sm:$0x1] %vm39_vm6, %v38_v9  }
  0x84   :  { %v44_v14 = vpop.permute.xlu0 %43  }
  0x85   :  { %46 = vst.msk [vmem:[#allocation0] sm:$0x1] %vm45_vm7, %v44_v14  }
  0x8c   :  { %v49_v15 = vld [vmem:[#allocation0] sm:$0x1] }
  0x8d   :  { %52 = vst [vmem:[%s112_s1] sm:$0x1] %v49_v15 }

// kernel: downsample_forward.2
= control target key start
LH: loop header
LB: loop body
LE: loop exit
PB: predicated region body
PF: predicated region fallthrough
CT: control target
= control target key end

     0   :  { %s613_s18 = smov 0   ;;  %s903_s0 = inlined_call_operand.vmem [shape: f32[2,8,576], index: 0, kind: input, shape index: {}]   ;;  %s904_s1 = inlined_call_operand.vmem [shape: f32[576,64], index: 1, kind: input, shape index: {}]   ;;  %s905_s2 = inlined_call_operand.vmem [shape: f32[64,64], index: 2, kind: input, shape index: {}]   ;;  %s906_s3 = inlined_call_operand.vmem [shape: f32[1,64], index: 3, kind: input, shape index: {}]   ;;  %s907_s4 = inlined_call_operand.vmem [shape: f32[1,64], index: 4, kind: input, shape index: {}]   ;;  %s908_s5 = inlined_call_operand.vmem [shape: f32[2,8,64], index: 5, kind: output, shape index: {}]  }
   0x1 LB: > { %s551_s19 = sadd.s32 4294967295, %s581_s18   ;;  %p555_p0 = scmp.ge.s32.totalorder %s581_s18, 1  ;;  %s581_s18 = sphi %s613_s18, %s15_s18  }
   0x2   : > { %p187_p1 = scmp.lt.s32.totalorder %s581_s18, 3 }
   0x4   : > { %p188_p2 = pnand %p555_p0, %p187_p1 }
   0x5   : > { %p722_p3 = scmp.lt.s32.totalorder (!%p188_p2), %s551_s19, 1 }
   0x6   : > { %191 = sbr.rel (%p188_p2) target bundleno = 508 (0x1fc), region = 40 }
   0xb   : > { %v243_v0 = vld [vmem:[%s904_s1 + $0x78] sm:$0xff]  ;;  %v242_v1 = vld [vmem:[%s904_s1 + $0x70] sm:$0xff]  ;;  %v241_v5 = vld [vmem:[%s904_s1 + $0x68] sm:$0xff]  ;;  %s911_s19 = smov (!%p722_p3, %s551_s19), 1  ;;  %vm300_vm0 = vcmask 523264  }
   0xc   : > { %v275_v2 = vld [vmem:[%s904_s1 + $0x178] sm:$0xff]  ;;  %304 = vmatpush.msra.mxu0 %v243_v0  ;;  %v274_v3 = vld [vmem:[%s904_s1 + $0x170] sm:$0xff]  ;;  %v273_v7 = vld [vmem:[%s904_s1 + $0x168] sm:$0xff]  ;;  %s563_s27 = smul.u32 40, %s911_s19  ;;  %s557_s30 = sshll.u32 %s911_s19, 3 }
   0xd   : > { %344 = vmatpush.msra.mxu2 %v275_v2  ;;  %v291_v4 = vld [vmem:[%s904_s1 + $0x1f8] sm:$0xff]  ;;  %v290_v8 = vld [vmem:[%s904_s1 + $0x1f0] sm:$0xff]  ;;  %v240_v10 = vld [vmem:[%s904_s1 + $0x60] sm:$0xff]  ;;  %s222_s7 = scalar_lea.vmem %s908_s5, %s557_s30 }
   0xe   : > { %364 = vmatpush.msra.mxu3 %v291_v4  ;;  %v259_v6 = vld [vmem:[%s904_s1 + $0xf8] sm:$0xff]  ;;  %305 = vmatpush.msra.mxu0 %v242_v1  ;;  %v258_v9 = vld [vmem:[%s904_s1 + $0xf0] sm:$0xff]  ;;  %v272_v11 = vld [vmem:[%s904_s1 + $0x160] sm:$0xff]  ;;  %s808_s23 = scalar_lea.vmem %s903_s0, %s563_s27 }
   0xf   : > { %345 = vmatpush.msra.mxu2 %v274_v3  ;;  %324 = vmatpush.msra.mxu1 %v259_v6  ;;  %v289_v12 = vld [vmem:[%s904_s1 + $0x1e8] sm:$0xff]  ;;  %v288_v14 = vld [vmem:[%s904_s1 + $0x1e0] sm:$0xff]  ;;  %v239_v15 = vld [vmem:[%s904_s1 + $0x58] sm:$0xff] }
  0x10   : > { %365 = vmatpush.msra.mxu3 %v290_v8  ;;  %306 = vmatpush.msra.mxu0 %v241_v5  ;;  %v257_v13 = vld [vmem:[%s904_s1 + $0xe8] sm:$0xff]  ;;  %v271_v16 = vld [vmem:[%s904_s1 + $0x158] sm:$0xff]  ;;  %v256_v17 = vld [vmem:[%s904_s1 + $0xe0] sm:$0xff] }
  0x11   : > { %346 = vmatpush.msra.mxu2 %v273_v7  ;;  %325 = vmatpush.msra.mxu1 %v258_v9  ;;  %v287_v18 = vld [vmem:[%s904_s1 + $0x1d8] sm:$0xff]  ;;  %v238_v19 = vld [vmem:[%s904_s1 + $0x50] sm:$0xff]  ;;  %v237_v23 = vld [vmem:[%s904_s1 + $0x48] sm:$0xff] }
  0x12   : > { %366 = vmatpush.msra.mxu3 %v289_v12  ;;  %307 = vmatpush.msra.mxu0 %v240_v10  ;;  %v270_v20 = vld [vmem:[%s904_s1 + $0x150] sm:$0xff]  ;;  %v255_v21 = vld [vmem:[%s904_s1 + $0xd8] sm:$0xff]  ;;  %v269_v24 = vld [vmem:[%s904_s1 + $0x148] sm:$0xff] }
  0x13   : > { %347 = vmatpush.msra.mxu2 %v272_v11  ;;  %326 = vmatpush.msra.mxu1 %v257_v13  ;;  %v286_v22 = vld [vmem:[%s904_s1 + $0x1d0] sm:$0xff]  ;;  %v285_v26 = vld [vmem:[%s904_s1 + $0x1c8] sm:$0xff]  ;;  %v236_v27 = vld [vmem:[%s904_s1 + $0x40] sm:$0xff] }
  0x14   : > { %367 = vmatpush.msra.mxu3 %v288_v14  ;;  %308 = vmatpush.msra.mxu0 %v239_v15  ;;  %v254_v25 = vld [vmem:[%s904_s1 + $0xd0] sm:$0xff]  ;;  %v268_v28 = vld [vmem:[%s904_s1 + $0x140] sm:$0xff]  ;;  %v253_v29 = vld [vmem:[%s904_s1 + $0xc8] sm:$0xff] }
  0x15   : > { %348 = vmatpush.msra.mxu2 %v271_v16  ;;  %327 = vmatpush.msra.mxu1 %v256_v17  ;;  %v284_v30 = vld [vmem:[%s904_s1 + $0x1c0] sm:$0xff]  ;;  %v235_v31 = vld [vmem:[%s904_s1 + $0x38] sm:$0xff]  ;;  %v234_v35 = vld [vmem:[%s904_s1 + $0x30] sm:$0xff] }
  0x16   : > { %368 = vmatpush.msra.mxu3 %v287_v18  ;;  %309 = vmatpush.msra.mxu0 %v238_v19  ;;  %v267_v32 = vld [vmem:[%s904_s1 + $0x138] sm:$0xff]  ;;  %v252_v33 = vld [vmem:[%s904_s1 + $0xc0] sm:$0xff]  ;;  %v266_v36 = vld [vmem:[%s904_s1 + $0x130] sm:$0xff] }
  0x17   : > { %349 = vmatpush.msra.mxu2 %v270_v20  ;;  %328 = vmatpush.msra.mxu1 %v255_v21  ;;  %v283_v34 = vld [vmem:[%s904_s1 + $0x1b8] sm:$0xff]  ;;  %v282_v38 = vld [vmem:[%s904_s1 + $0x1b0] sm:$0xff]  ;;  %v233_v39 = vld [vmem:[%s904_s1 + $0x28] sm:$0xff] }
  0x18   : > { %369 = vmatpush.msra.mxu3 %v286_v22  ;;  %310 = vmatpush.msra.mxu0 %v237_v23  ;;  %v251_v37 = vld [vmem:[%s904_s1 + $0xb8] sm:$0xff]  ;;  %v265_v40 = vld [vmem:[%s904_s1 + $0x128] sm:$0xff]  ;;  %v250_v41 = vld [vmem:[%s904_s1 + $0xb0] sm:$0xff] }
  0x19   : > { %350 = vmatpush.msra.mxu2 %v269_v24  ;;  %329 = vmatpush.msra.mxu1 %v254_v25  ;;  %v281_v42 = vld [vmem:[%s904_s1 + $0x1a8] sm:$0xff]  ;;  %v232_v43 = vld [vmem:[%s904_s1 + $0x20] sm:$0xff]  ;;  %v231_v47 = vld [vmem:[%s904_s1 + $0x18] sm:$0xff] }
  0x1a   : > { %370 = vmatpush.msra.mxu3 %v285_v26  ;;  %311 = vmatpush.msra.mxu0 %v236_v27  ;;  %v264_v44 = vld [vmem:[%s904_s1 + $0x120] sm:$0xff]  ;;  %v249_v45 = vld [vmem:[%s904_s1 + $0xa8] sm:$0xff]  ;;  %v263_v48 = vld [vmem:[%s904_s1 + $0x118] sm:$0xff] }
  0x1b   : > { %351 = vmatpush.msra.mxu2 %v268_v28  ;;  %330 = vmatpush.msra.mxu1 %v253_v29  ;;  %v280_v46 = vld [vmem:[%s904_s1 + $0x1a0] sm:$0xff]  ;;  %v279_v50 = vld [vmem:[%s904_s1 + $0x198] sm:$0xff]  ;;  %v230_v51 = vld [vmem:[%s904_s1 + $0x10] sm:$0xff] }
  0x1c   : > { %371 = vmatpush.msra.mxu3 %v284_v30  ;;  %312 = vmatpush.msra.mxu0 %v235_v31  ;;  %v248_v49 = vld [vmem:[%s904_s1 + $0xa0] sm:$0xff]  ;;  %v262_v52 = vld [vmem:[%s904_s1 + $0x110] sm:$0xff]  ;;  %v247_v53 = vld [vmem:[%s904_s1 + $0x98] sm:$0xff] }
  0x1d   : > { %352 = vmatpush.msra.mxu2 %v267_v32  ;;  %331 = vmatpush.msra.mxu1 %v252_v33  ;;  %v278_v54 = vld [vmem:[%s904_s1 + $0x190] sm:$0xff]  ;;  %v229_v55 = vld [vmem:[%s904_s1 + $0x8] sm:$0xff]  ;;  %v228_v59 = vld [vmem:[%s904_s1] sm:$0xff] }
  0x1e   : > { %372 = vmatpush.msra.mxu3 %v283_v34  ;;  %313 = vmatpush.msra.mxu0 %v234_v35  ;;  %v261_v56 = vld [vmem:[%s904_s1 + $0x108] sm:$0xff]  ;;  %v246_v57 = vld [vmem:[%s904_s1 + $0x90] sm:$0xff]  ;;  %v260_v60 = vld [vmem:[%s904_s1 + $0x100] sm:$0xff] }
  0x1f   : > { %353 = vmatpush.msra.mxu2 %v266_v36  ;;  %332 = vmatpush.msra.mxu1 %v251_v37  ;;  %v277_v58 = vld [vmem:[%s904_s1 + $0x188] sm:$0xff]  ;;  %v299_v61 = vld [vmem:[%s904_s1 + $0x238] sm:$0xff]  ;;  %v225_v62 = vld [vmem:[%s808_s23 + $0x10] sm:$0xff] }
  0x20   : > { %373 = vmatpush.msra.mxu3 %v282_v38  ;;  %314 = vmatpush.msra.mxu0 %v233_v39  ;;  %v245_v63 = vld [vmem:[%s904_s1 + $0x88] sm:$0xff]  ;;  %v276_v0 = vld [vmem:[%s904_s1 + $0x180] sm:$0xff]  ;;  %v298_v1 = vld [vmem:[%s904_s1 + $0x230] sm:$0xff] }
  0x21   : > { %354 = vmatpush.msra.mxu2 %v265_v40  ;;  %333 = vmatpush.msra.mxu1 %v250_v41  ;;  %v226_v2 = vld [vmem:[%s808_s23 + $0x18] sm:$0xff]  ;;  %v244_v3 = vld [vmem:[%s904_s1 + $0x80] sm:$0xff]  ;;  %v297_v5 = vld [vmem:[%s904_s1 + $0x228] sm:$0xff] }
  0x22   : > { %374 = vmatpush.msra.mxu3 %v281_v42  ;;  %315 = vmatpush.msra.mxu0 %v232_v43  ;;  %v223_v4 = vld [vmem:[%s808_s23] sm:$0xff]  ;;  %v224_v6 = vld [vmem:[%s808_s23 + $0x8] sm:$0xff]  ;;  %v295_v8 = vld [vmem:[%s904_s1 + $0x218] sm:$0xff] }
  0x23   : > { %355 = vmatpush.msra.mxu2 %v264_v44  ;;  %334 = vmatpush.msra.mxu1 %v249_v45  ;;  %v296_v7 = vld [vmem:[%s904_s1 + $0x220] sm:$0xff]  ;;  %v294_v9 = vld [vmem:[%s904_s1 + $0x210] sm:$0xff]  ;;  %v293_v10 = vld [vmem:[%s904_s1 + $0x208] sm:$0xff] }
  0x24   : > { %375 = vmatpush.msra.mxu3 %v280_v46  ;;  %316 = vmatpush.msra.mxu0 %v231_v47  ;;  %v292_v11 = vld [vmem:[%s904_s1 + $0x200] sm:$0xff]  ;;  %v418_v13 = vld [vmem:[%s905_s2 + $0x38] sm:$0xff]  ;;  %v417_v14 = vld [vmem:[%s905_s2 + $0x30] sm:$0xff] }
  0x25   : > { %356 = vmatpush.msra.mxu2 %v263_v48  ;;  %335 = vmatpush.msra.mxu1 %v248_v49  ;;  %v227_v12 = vld [vmem:[%s808_s23 + $0x20] sm:$0xff]  ;;  %v416_v15 = vld [vmem:[%s905_s2 + $0x28] sm:$0xff]  ;;  %v414_v17 = vld [vmem:[%s905_s2 + $0x18] sm:$0xff] }
  0x26   : > { %376 = vmatpush.msra.mxu3 %v279_v50  ;;  %317 = vmatpush.msra.mxu0 %v230_v51  ;;  %v415_v16 = vld [vmem:[%s905_s2 + $0x20] sm:$0xff]  ;;  %v413_v18 = vld [vmem:[%s905_s2 + $0x10] sm:$0xff]  ;;  %v412_v19 = vld [vmem:[%s905_s2 + $0x8] sm:$0xff] }
  0x27   : > { %357 = vmatpush.msra.mxu2 %v262_v52  ;;  %336 = vmatpush.msra.mxu1 %v247_v53  ;;  %v411_v20 = vld [vmem:[%s905_s2] sm:$0xff] }
  0x28   : > { %377 = vmatpush.msra.mxu3 %v278_v54  ;;  %318 = vmatpush.msra.mxu0 %v229_v55  ;;  %v452_v55 = vld [vmem:[%s906_s3] sm:$0x1] }
  0x29   : > { %358 = vmatpush.msra.mxu2 %v261_v56  ;;  %337 = vmatpush.msra.mxu1 %v246_v57 }
  0x2a   : > { %378 = vmatpush.msra.mxu3 %v277_v58  ;;  %319 = vmatpush.msra.mxu0 %v228_v59 }
  0x2b   : > { %359 = vmatpush.msra.mxu2 %v260_v60  ;;  %338 = vmatpush.msra.mxu1 %v245_v63  ;;  %v572_v60 = vld [vmem:[%s907_s4] ss:$0 sm:$0xff] }
  0x2c   : > { %392 = vmatpush.msrb.mxu0 %v299_v61  ;;  %360 = vmatmul.f32.vlgmr.msra.gmra.mxu2 %v225_v62 }
  0x2d   : > { %379 = vmatpush.msra.mxu3 %v276_v0  ;;  %339 = vmatpush.msra.mxu1 %v244_v3 }
  0x2e   : > { %393 = vmatpush.msrb.mxu0 %v298_v1  ;;  %380 = vmatmul.f32.vlgmr.msra.gmra.mxu3 %v226_v2 }
  0x2f   : > { %320 = vmatmul.f32.vlgmr.msra.gmra.mxu0 %v223_v4  ;;  %340 = vmatmul.f32.vlgmr.msra.gmra.mxu1 %v224_v6 }
  0x30   : > { %394 = vmatpush.msrb.mxu0 %v297_v5  ;;  %430 = vmatpush.msrb.mxu1 %v418_v13 }
  0x31   : > { %464 = vmatpush.msrb.mxu2 %v418_v13 }
  0x32   : > { %395 = vmatpush.msrb.mxu0 %v296_v7  ;;  %431 = vmatpush.msrb.mxu1 %v417_v14 }
  0x33   : > { %465 = vmatpush.msrb.mxu2 %v417_v14 }
  0x34   : > { %396 = vmatpush.msrb.mxu0 %v295_v8  ;;  %432 = vmatpush.msrb.mxu1 %v416_v15 }
  0x35   : > { %466 = vmatpush.msrb.mxu2 %v416_v15 }
  0x36   : > { %397 = vmatpush.msrb.mxu0 %v294_v9  ;;  %433 = vmatpush.msrb.mxu1 %v415_v16 }
  0x37   : > { %467 = vmatpush.msrb.mxu2 %v415_v16 }
  0x38   : > { %398 = vmatpush.msrb.mxu0 %v293_v10  ;;  %434 = vmatpush.msrb.mxu1 %v414_v17 }
  0x39   : > { %468 = vmatpush.msrb.mxu2 %v414_v17 }
  0x3a   : > { %399 = vmatpush.msrb.mxu0 %v292_v11  ;;  %435 = vmatpush.msrb.mxu1 %v413_v18 }
  0x3b   : > { %558 = vmatmul.msk.f32.vlgmr.msrb.gmra.mxu0 %vm300_vm0, %v227_v12  ;;  %469 = vmatpush.msrb.mxu2 %v413_v18 }
  0x3c   : > { %436 = vmatpush.msrb.mxu1 %v412_v19 }
  0x3d   : > { %470 = vmatpush.msrb.mxu2 %v412_v19 }
  0x3e   : > { %437 = vmatpush.msrb.mxu1 %v411_v20 }
  0x3f   : > { %471 = vmatpush.msrb.mxu2 %v411_v20 }
  0xac   : > { %v321_v21 = vpop.f32.mrf.mxu0  ;;  %v341_v22 = vpop.f32.mrf.mxu1 }
  0xad   : > { %v342_v23 = vadd.f32 %v341_v22, %v321_v21 }
  0xaf   : > { %v361_v24 = vpop.f32.mrf.mxu2 }
  0xb0   : > { %v362_v25 = vadd.f32 %v361_v24, %v342_v23 }
  0xb1   : > { %v381_v26 = vpop.f32.mrf.mxu3 }
  0xb2   : > { %v382_v27 = vadd.f32 %v381_v26, %v362_v25 }
  0xb8   : > { %v401_v28 = vpop.f32.mrf.mxu0 }
  0xb9   : > { %v402_v29 = vadd.f32 %v401_v28, %v382_v27 }
  0xbb   : > { %v404_v30 = vsel %vm300_vm0, %v402_v29, 0.0 }
  0xbc   : > { %v405_v31 = vrot.slane %v404_v30, 4 }
  0xbe   : > { %v406_v32 = vadd.f32 %v405_v31, %v404_v30 }
  0xc0   : > { %v407_v33 = vrot.slane %v406_v32, 2 }
  0xc2   : > { %v408_v34 = vadd.f32 %v407_v33, %v406_v32 }
  0xc4   : > { %v409_v35 = vrot.slane %v408_v34, 1 }
  0xc6   : > { %v410_v36 = vadd.f32 %v409_v35, %v408_v34 }
  0xc8   : > { %559 = vmatmul.msk.f32.vlgmr.msrb.gmra.mxu1 %vm300_vm0, %v410_v36 }
 0x145   : > { %v439_v37 = vpop.f32.mrf.mxu1 }
 0x146   : > { %v442_v38 = vperm.slane %v439_v37, 0 }
 0x148   : > { %v443_v39 = vsub.f32 %v402_v29, %v442_v38 }
 0x14a   : > { %v444_v40 = vmul.f32 %v443_v39, %v443_v39 }
 0x14c   : > { %v445_v41 = vsel %vm300_vm0, %v444_v40, 0.0 }
 0x14d   : > { %v446_v42 = vrot.slane %v445_v41, 4 }
 0x14f   : > { %v447_v43 = vadd.f32 %v446_v42, %v445_v41 }
 0x151   : > { %v448_v44 = vrot.slane %v447_v43, 2 }
 0x153   : > { %v449_v45 = vadd.f32 %v448_v44, %v447_v43 }
 0x155   : > { %v450_v46 = vrot.slane %v449_v45, 1 }
 0x157   : > { %v451_v47 = vadd.f32 %v450_v46, %v449_v45 }
 0x159   : > { %560 = vmatmul.msk.f32.vlgmr.msrb.gmra.mxu2 %vm300_vm0, %v451_v47 }
 0x1dc   : > { %v473_v48 = vpop.f32.mrf.mxu2 }
 0x1dd   : > { %v474_v49 = vadd.f32 1e-05, %v473_v48 }
 0x1df   : > { %573 = vrsqrt.f32 %v474_v49  ;;  %vm482_vm2 = vweird.f32 %v474_v49 }
 0x1e5   : > { %v574_v50 = vpop.eup %573 }
 0x1e6   : > { %v477_v51 = vmul.f32 %v574_v50, %v474_v49  ;;  %vm483_vm1 = vweird.f32 %v574_v50 }
 0x1e7   : > { %vm484_vm3 = vmor %vm482_vm2, %vm483_vm1 }
 0x1e8   : > { %v478_v52 = vmul.f32 %v574_v50, %v477_v51 }
 0x1ea   : > { %v479_v53 = vmul.f32 0.5, %v478_v52 }
 0x1ec   : > { %v480_v54 = vsub.f32 1.5, %v479_v53 }
 0x1ee   : > { %v481_v56 = vmul.f32 %v574_v50, %v480_v54 }
 0x1f0   : > { %v485_v57 = vsel %vm484_vm3, %v574_v50, %v481_v56 }
 0x1f1   : > { %v486_v58 = vmul.f32 %v485_v57, %v452_v55 }
 0x1f3   : > { %v488_v59 = vperm.slane %v486_v58, 0 }
 0x1f5   : > { %v490_v61 = vmul.f32 %v488_v59, %v443_v39 }
 0x1f7   : > { %v495_v62 = vadd.f32 %v572_v60, %v490_v61 }
 0x1f9   : > { %v496_v63 = vmax.f32 %v495_v62, 0.0 }
 0x1fb   : > { %497 = vst.msk [vmem:[%s222_s7] sm:$0xff] %vm300_vm0, %v496_v63 }
 0x1fc PF: > { %s15_s18 = sadd.s32 1, %s581_s18  }
 0x1fd   : > { %p12_p4 = scmp.ge.s32.totalorder %s15_s18, 4  }
 0x1ff   :  { %14 = sbr.rel (!%p12_p4) target bundleno = 1 (0x1), region = 70 }

// kernel: tile.33
= control target key start
LH: loop header
LB: loop body
LE: loop exit
PB: predicated region body
PF: predicated region fallthrough
CT: control target
= control target key end

     0   :  { %s22_s0 = inlined_call_operand.vmem [shape: f32[32], index: 0, kind: input, shape index: {}]   ;;  %s23_s1 = inlined_call_operand.vmem [shape: f32[4,32], index: 1, kind: output, shape index: {}]  }
   0x1   :  { %v4_v0 = vld [vmem:[%s22_s0] ss:$0 sm:$0xff] }
   0x2   :  { %5 = vst [vmem:[%s23_s1] sm:$0xf] %v4_v0 }

// kernel: tile.34
= control target key start
LH: loop header
LB: loop body
LE: loop exit
PB: predicated region body
PF: predicated region fallthrough
CT: control target
= control target key end

     0   :  { %s37_s8 = smov 32   ;;  %s38_s9 = smov 64   ;;  %vm7_vm0 = vcmask 261120   ;;  %vm13_vm1 = vcmask 1048320   ;;  %vm19_vm2 = vcmask 785920   ;;  %vm25_vm3 = vcmask 523520   ;;  %s55_s0 = inlined_call_operand.vmem [shape: f32[4,32], index: 0, kind: input, shape index: {}]   ;;  %s56_s1 = inlined_call_operand.vmem [shape: f32[1,128], index: 1, kind: output, shape index: {}]  }
   0x1   :  { %v4_v0 = vld [vmem:[%s55_s0] sm:$0xf]  ;;  %s36_s0 = smov 96  }
   0x2   :  { %5 = vst [vmem:[#allocation1] sm:$0xf] %v4_v0 }
   0x9   :  { %v10_v1 = vld [vmem:[#allocation1 + $0x3] sm:$0x1]   ;;  %v22_v2 = vld [vmem:[#allocation1 + $0x1] sm:$0x1]   ;;  %v16_v3 = vld [vmem:[#allocation1 + $0x2] sm:$0x1]  }
   0xa   :  { %11 = vrot.lane.b32.xlu0 %v10_v1, %s36_s0  ;;  %23 = vrot.lane.b32.xlu1 %v22_v2, %s37_s8  ;;  %v6_v4 = vld [vmem:[#allocation1] sm:$0x1]  }
   0xb   :  { %8 = vst.msk [vmem:[#allocation0] sm:$0x1] %vm7_vm0, %v6_v4  }
  0x12   :  { %17 = vrot.lane.b32.xlu0 %v16_v3, %s38_s9 }
  0x7c   :  { %v12_v5 = vpop.permute.xlu0 %11   ;;  %v24_v6 = vpop.permute.xlu1 %23  }
  0x7d   :  { %14 = vst.msk [vmem:[#allocation0] sm:$0x1] %vm13_vm1, %v12_v5  }
  0x84   :  { %v18_v7 = vpop.permute.xlu0 %17  }
  0x85   :  { %20 = vst.msk [vmem:[#allocation0] sm:$0x1] %vm19_vm2, %v18_v7  }
  0x86   :  { %26 = vst.msk [vmem:[#allocation0] sm:$0x1] %vm25_vm3, %v24_v6  }
  0x8d   :  { %v29_v8 = vld [vmem:[#allocation0] sm:$0x1] }
  0x8e   :  { %32 = vst [vmem:[%s56_s1] sm:$0x1] %v29_v8 }

// kernel: downsample_forward.3
= control target key start
LH: loop header
LB: loop body
LE: loop exit
PB: predicated region body
PF: predicated region fallthrough
CT: control target
= control target key end

     0   :  { %s547_s18 = smov 0   ;;  %s742_s0 = inlined_call_operand.vmem [shape: f32[2,4,320], index: 0, kind: input, shape index: {}]   ;;  %s743_s1 = inlined_call_operand.vmem [shape: f32[320,128], index: 1, kind: input, shape index: {}]   ;;  %s744_s2 = inlined_call_operand.vmem [shape: f32[128,128], index: 2, kind: input, shape index: {}]   ;;  %s745_s3 = inlined_call_operand.vmem [shape: f32[1,128], index: 3, kind: input, shape index: {}]   ;;  %s746_s4 = inlined_call_operand.vmem [shape: f32[1,128], index: 4, kind: input, shape index: {}]   ;;  %s747_s5 = inlined_call_operand.vmem [shape: f32[2,4,128], index: 5, kind: output, shape index: {}]  }
   0x1 LB: > { %s487_s19 = sadd.s32 4294967295, %s515_s18   ;;  %p491_p0 = scmp.ge.s32.totalorder %s515_s18, 1  ;;  %s515_s18 = sphi %s547_s18, %s15_s18  }
   0x2   : > { %p187_p1 = scmp.lt.s32.totalorder %s515_s18, 3 }
   0x4   : > { %p188_p2 = pnand %p491_p0, %p187_p1 }
   0x5   : > { %p214_p3 = scmp.lt.s32.totalorder (!%p188_p2), %s487_s19, 1 }
   0x6   : > { %191 = sbr.rel (%p188_p2) target bundleno = 499 (0x1f3), region = 40 }
   0xb   : > { %v240_v0 = vld [vmem:[%s743_s1 + $0x78] sm:$0xff]  ;;  %v239_v2 = vld [vmem:[%s743_s1 + $0x70] sm:$0xff]  ;;  %v238_v4 = vld [vmem:[%s743_s1 + $0x68] sm:$0xff]  ;;  %s749_s19 = smov (!%p214_p3, %s487_s19), 1  ;;  %vm275_vm0 = vcmask 523264   ;;  %vm338_vm1 = vcmask 1043456  }
   0xc   : > { %v256_v1 = vld [vmem:[%s743_s1 + $0xf8] sm:$0xff]  ;;  %278 = vmatpush.msra.mxu0 %v240_v0  ;;  %v255_v3 = vld [vmem:[%s743_s1 + $0xf0] sm:$0xff]  ;;  %v254_v5 = vld [vmem:[%s743_s1 + $0xe8] sm:$0xff]  ;;  %s497_s15 = smul.u32 12, %s749_s19  ;;  %s493_s23 = sshll.u32 %s749_s19, 2 }
   0xd   : > { %298 = vmatpush.msra.mxu1 %v256_v1  ;;  %v237_v6 = vld [vmem:[%s743_s1 + $0x60] sm:$0xff]  ;;  %v264_v8 = vld [vmem:[%s743_s1 + $0x138] sm:$0xff]  ;;  %v263_v9 = vld [vmem:[%s743_s1 + $0x130] sm:$0xff]  ;;  %s222_s28 = scalar_lea.vmem %s747_s5, %s493_s23 }
   0xe   : > { %279 = vmatpush.msra.mxu0 %v239_v2  ;;  %v253_v7 = vld [vmem:[%s743_s1 + $0xe0] sm:$0xff]  ;;  %v236_v10 = vld [vmem:[%s743_s1 + $0x58] sm:$0xff]  ;;  %326 = vmatpush.msra.mxu2 %v264_v8  ;;  %v262_v12 = vld [vmem:[%s743_s1 + $0x128] sm:$0xff]  ;;  %s218_s7 = scalar_lea.vmem %s742_s0, %s497_s15 }
   0xf   : > { %299 = vmatpush.msra.mxu1 %v255_v3  ;;  %v252_v11 = vld [vmem:[%s743_s1 + $0xd8] sm:$0xff]  ;;  %v235_v13 = vld [vmem:[%s743_s1 + $0x50] sm:$0xff]  ;;  %v261_v15 = vld [vmem:[%s743_s1 + $0x120] sm:$0xff] }
  0x10   : > { %280 = vmatpush.msra.mxu0 %v238_v4  ;;  %v251_v14 = vld [vmem:[%s743_s1 + $0xd0] sm:$0xff]  ;;  %327 = vmatpush.msra.mxu2 %v263_v9  ;;  %v234_v16 = vld [vmem:[%s743_s1 + $0x48] sm:$0xff]  ;;  %v260_v18 = vld [vmem:[%s743_s1 + $0x118] sm:$0xff] }
  0x11   : > { %300 = vmatpush.msra.mxu1 %v254_v5  ;;  %v250_v17 = vld [vmem:[%s743_s1 + $0xc8] sm:$0xff]  ;;  %v233_v19 = vld [vmem:[%s743_s1 + $0x40] sm:$0xff]  ;;  %v259_v22 = vld [vmem:[%s743_s1 + $0x110] sm:$0xff] }
  0x12   : > { %281 = vmatpush.msra.mxu0 %v237_v6  ;;  %328 = vmatpush.msra.mxu2 %v262_v12  ;;  %v249_v20 = vld [vmem:[%s743_s1 + $0xc0] sm:$0xff]  ;;  %v224_v21 = vld [vmem:[%s218_s7 + $0x8] sm:$0xf]  ;;  %v232_v24 = vld [vmem:[%s743_s1 + $0x38] sm:$0xff] }
  0x13   : > { %301 = vmatpush.msra.mxu1 %v253_v7  ;;  %269 = vst [vmem:[#allocation1 + $0x10] ss:$2 sm:$0xff] %v224_v21  ;;  %v223_v23 = vld [vmem:[%s218_s7] sm:$0xff]  ;;  %v248_v25 = vld [vmem:[%s743_s1 + $0xb8] sm:$0xff]  ;;  %v258_v27 = vld [vmem:[%s743_s1 + $0x108] sm:$0xff] }
  0x14   : > { %282 = vmatpush.msra.mxu0 %v236_v10  ;;  %329 = vmatpush.msra.mxu2 %v261_v15  ;;  %267 = vst [vmem:[#allocation1] ss:$2 sm:$0xff] %v223_v23  ;;  %v361_v26 = vld [vmem:[%s744_s2 + $0x78] sm:$0xff]  ;;  %v360_v28 = vld [vmem:[%s744_s2 + $0x70] sm:$0xff]  ;;  %v257_v31 = vld [vmem:[%s743_s1 + $0x100] sm:$0xff] }
  0x15   : > { %302 = vmatpush.msra.mxu1 %v252_v11  ;;  %v231_v29 = vld [vmem:[%s743_s1 + $0x30] sm:$0xff]  ;;  %362 = vmatpush.msra.mxu3 %v361_v26  ;;  %v359_v32 = vld [vmem:[%s744_s2 + $0x68] sm:$0xff]  ;;  %v358_v35 = vld [vmem:[%s744_s2 + $0x60] sm:$0xff] }
  0x16   : > { %283 = vmatpush.msra.mxu0 %v235_v13  ;;  %330 = vmatpush.msra.mxu2 %v260_v18  ;;  %v247_v30 = vld [vmem:[%s743_s1 + $0xb0] sm:$0xff]  ;;  %v230_v33 = vld [vmem:[%s743_s1 + $0x28] sm:$0xff]  ;;  %v229_v36 = vld [vmem:[%s743_s1 + $0x20] sm:$0xff] }
  0x17   : > { %303 = vmatpush.msra.mxu1 %v251_v14  ;;  %v246_v34 = vld [vmem:[%s743_s1 + $0xa8] sm:$0xff]  ;;  %363 = vmatpush.msra.mxu3 %v360_v28  ;;  %v245_v37 = vld [vmem:[%s743_s1 + $0xa0] sm:$0xff]  ;;  %v357_v39 = vld [vmem:[%s744_s2 + $0x58] sm:$0xff] }
  0x18   : > { %284 = vmatpush.msra.mxu0 %v234_v16  ;;  %331 = vmatpush.msra.mxu2 %v259_v22  ;;  %v228_v40 = vld [vmem:[%s743_s1 + $0x18] sm:$0xff]  ;;  %v356_v42 = vld [vmem:[%s744_s2 + $0x50] sm:$0xff]  ;;  %v355_v45 = vld [vmem:[%s744_s2 + $0x48] sm:$0xff] }
  0x19   : > { %304 = vmatpush.msra.mxu1 %v250_v17  ;;  %364 = vmatpush.msra.mxu3 %v359_v32  ;;  %v244_v41 = vld [vmem:[%s743_s1 + $0x98] sm:$0xff]  ;;  %v227_v43 = vld [vmem:[%s743_s1 + $0x10] sm:$0xff]  ;;  %v226_v46 = vld [vmem:[%s743_s1 + $0x8] sm:$0xff] }
  0x1a   : > { %285 = vmatpush.msra.mxu0 %v233_v19  ;;  %332 = vmatpush.msra.mxu2 %v258_v27  ;;  %v272_v38 = vld.sshfl [vmem:[#allocation1 + $0x10] sm:$0xff pattern:$0x75316420]  ;;  %v242_v47 = vld [vmem:[%s743_s1 + $0x88] sm:$0xff]  ;;  %v225_v48 = vld [vmem:[%s743_s1] sm:$0xff] }
  0x1b   : > { %305 = vmatpush.msra.mxu1 %v249_v20  ;;  %365 = vmatpush.msra.mxu3 %v358_v35  ;;  %v243_v44 = vld [vmem:[%s743_s1 + $0x90] sm:$0xff]  ;;  %v241_v49 = vld [vmem:[%s743_s1 + $0x80] sm:$0xff]  ;;  %v271_v51 = vld.sshfl [vmem:[#allocation1 + $0x8] sm:$0xff pattern:$0x75316420] }
  0x1c   : > { %286 = vmatpush.msra.mxu0 %v232_v24  ;;  %333 = vmatpush.msra.mxu2 %v257_v31  ;;  %v270_v50 = vld.sshfl [vmem:[#allocation1] sm:$0xff pattern:$0x75316420]  ;;  %v353_v53 = vld [vmem:[%s744_s2 + $0x38] sm:$0xff]  ;;  %v352_v54 = vld [vmem:[%s744_s2 + $0x30] sm:$0xff] }
  0x1d   : > { %306 = vmatpush.msra.mxu1 %v248_v25  ;;  %494 = vmatmul.msk.f32.vlgmr.msra.gmra.mxu2 %vm275_vm0, %v272_v38  ;;  %v354_v52 = vld [vmem:[%s744_s2 + $0x40] sm:$0xff]  ;;  %v351_v55 = vld [vmem:[%s744_s2 + $0x28] sm:$0xff]  ;;  %v349_v57 = vld [vmem:[%s744_s2 + $0x18] sm:$0xff] }
  0x1e   : > { %287 = vmatpush.msra.mxu0 %v231_v29  ;;  %366 = vmatpush.msra.mxu3 %v357_v39  ;;  %v350_v56 = vld [vmem:[%s744_s2 + $0x20] sm:$0xff]  ;;  %v348_v58 = vld [vmem:[%s744_s2 + $0x10] sm:$0xff]  ;;  %v347_v59 = vld [vmem:[%s744_s2 + $0x8] sm:$0xff] }
  0x1f   : > { %307 = vmatpush.msra.mxu1 %v247_v30  ;;  %393 = vmatpush.msrb.mxu2 %v361_v26  ;;  %v346_v60 = vld [vmem:[%s744_s2] sm:$0xff] }
  0x20   : > { %288 = vmatpush.msra.mxu0 %v230_v33  ;;  %367 = vmatpush.msra.mxu3 %v356_v42  ;;  %v392_v27 = vld [vmem:[%s745_s3] sm:$0x1] }
  0x21   : > { %308 = vmatpush.msra.mxu1 %v246_v34  ;;  %394 = vmatpush.msrb.mxu2 %v360_v28 }
  0x22   : > { %289 = vmatpush.msra.mxu0 %v229_v36  ;;  %368 = vmatpush.msra.mxu3 %v355_v45 }
  0x23   : > { %309 = vmatpush.msra.mxu1 %v245_v37  ;;  %395 = vmatpush.msrb.mxu2 %v359_v32  ;;  %v506_v32 = vld [vmem:[%s746_s4] ss:$0 sm:$0xff] }
  0x24   : > { %290 = vmatpush.msra.mxu0 %v228_v40  ;;  %369 = vmatpush.msra.mxu3 %v354_v52 }
  0x25   : > { %310 = vmatpush.msra.mxu1 %v244_v41  ;;  %396 = vmatpush.msrb.mxu2 %v358_v35 }
  0x26   : > { %291 = vmatpush.msra.mxu0 %v227_v43  ;;  %370 = vmatpush.msra.mxu3 %v353_v53 }
  0x27   : > { %311 = vmatpush.msra.mxu1 %v243_v44  ;;  %397 = vmatpush.msrb.mxu2 %v357_v39 }
  0x28   : > { %292 = vmatpush.msra.mxu0 %v226_v46  ;;  %371 = vmatpush.msra.mxu3 %v352_v54 }
  0x29   : > { %312 = vmatpush.msra.mxu1 %v242_v47  ;;  %398 = vmatpush.msrb.mxu2 %v356_v42 }
  0x2a   : > { %293 = vmatpush.msra.mxu0 %v225_v48  ;;  %372 = vmatpush.msra.mxu3 %v351_v55 }
  0x2b   : > { %313 = vmatpush.msra.mxu1 %v241_v49  ;;  %294 = vmatmul.f32.vlgmr.msra.gmra.mxu0 %v270_v50 }
  0x2c   : > { %314 = vmatmul.f32.vlgmr.msra.gmra.mxu1 %v271_v51  ;;  %399 = vmatpush.msrb.mxu2 %v355_v45 }
  0x2d   : > { %373 = vmatpush.msra.mxu3 %v350_v56 }
  0x2e   : > { %400 = vmatpush.msrb.mxu2 %v354_v52 }
  0x2f   : > { %374 = vmatpush.msra.mxu3 %v349_v57 }
  0x30   : > { %401 = vmatpush.msrb.mxu2 %v353_v53 }
  0x31   : > { %375 = vmatpush.msra.mxu3 %v348_v58 }
  0x32   : > { %402 = vmatpush.msrb.mxu2 %v352_v54 }
  0x33   : > { %376 = vmatpush.msra.mxu3 %v347_v59 }
  0x34   : > { %403 = vmatpush.msrb.mxu2 %v351_v55 }
  0x35   : > { %377 = vmatpush.msra.mxu3 %v346_v60 }
  0x36   : > { %404 = vmatpush.msrb.mxu2 %v350_v56 }
  0x38   : > { %405 = vmatpush.msrb.mxu2 %v349_v57 }
  0x3a   : > { %406 = vmatpush.msrb.mxu2 %v348_v58 }
  0x3c   : > { %407 = vmatpush.msrb.mxu2 %v347_v59 }
  0x3e   : > { %408 = vmatpush.msrb.mxu2 %v346_v60 }
  0xa0   : > { %v335_v61 = vpop.f32.mrf.mxu2 }
  0xa8   : > { %v295_v62 = vpop.f32.mrf.mxu0 }
  0xa9   : > { %v315_v63 = vpop.f32.mrf.mxu1 }
  0xaa   : > { %v316_v0 = vadd.f32 %v315_v63, %v295_v62 }
  0xac   : > { %v336_v1 = vadd.f32 %v335_v61, %v316_v0 }
  0xae   : > { %v339_v2 = vsel %vm338_vm1, %v336_v1, 0.0 }
  0xaf   : > { %v340_v3 = vrot.slane %v339_v2, 4 }
  0xb1   : > { %v341_v4 = vadd.f32 %v340_v3, %v339_v2 }
  0xb3   : > { %v342_v5 = vrot.slane %v341_v4, 2 }
  0xb5   : > { %v343_v6 = vadd.f32 %v342_v5, %v341_v4 }
  0xb7   : > { %v344_v7 = vrot.slane %v343_v6, 1 }
  0xb9   : > { %v345_v8 = vadd.f32 %v344_v7, %v343_v6 }
  0xbb   : > { %378 = vmatmul.f32.vlgmr.msra.gmra.mxu3 %v345_v8 }
 0x13e   : > { %v379_v9 = vpop.f32.mrf.mxu3 }
 0x13f   : > { %v382_v10 = vperm.slane %v379_v9, 0 }
 0x141   : > { %v383_v11 = vsub.f32 %v336_v1, %v382_v10 }
 0x143   : > { %v384_v12 = vmul.f32 %v383_v11, %v383_v11 }
 0x145   : > { %v385_v13 = vsel %vm338_vm1, %v384_v12, 0.0 }
 0x146   : > { %v386_v14 = vrot.slane %v385_v13, 4 }
 0x148   : > { %v387_v15 = vadd.f32 %v386_v14, %v385_v13 }
 0x14a   : > { %v388_v16 = vrot.slane %v387_v15, 2 }
 0x14c   : > { %v389_v17 = vadd.f32 %v388_v16, %v387_v15 }
 0x14e   : > { %v390_v18 = vrot.slane %v389_v17, 1 }
 0x150   : > { %v391_v19 = vadd.f32 %v390_v18, %v389_v17 }
 0x152   : > { %409 = vmatmul.f32.vlgmr.msrb.gmra.mxu2 %v391_v19 }
 0x1d5   : > { %v410_v20 = vpop.f32.mrf.mxu2 }
 0x1d6   : > { %v411_v21 = vadd.f32 1e-05, %v410_v20 }
 0x1d8   : > { %507 = vrsqrt.f32 %v411_v21  ;;  %vm419_vm3 = vweird.f32 %v411_v21 }
 0x1de   : > { %v508_v22 = vpop.eup %507 }
 0x1df   : > { %v414_v23 = vmul.f32 %v508_v22, %v411_v21  ;;  %vm420_vm2 = vweird.f32 %v508_v22 }
 0x1e0   : > { %vm421_vm4 = vmor %vm419_vm3, %vm420_vm2 }
 0x1e1   : > { %v415_v24 = vmul.f32 %v508_v22, %v414_v23 }
 0x1e3   : > { %v416_v25 = vmul.f32 0.5, %v415_v24 }
 0x1e5   : > { %v417_v26 = vsub.f32 1.5, %v416_v25 }
 0x1e7   : > { %v418_v28 = vmul.f32 %v508_v22, %v417_v26 }
 0x1e9   : > { %v422_v29 = vsel %vm421_vm4, %v508_v22, %v418_v28 }
 0x1ea   : > { %v423_v30 = vmul.f32 %v422_v29, %v392_v27 }
 0x1ec   : > { %v425_v31 = vperm.slane %v423_v30, 0 }
 0x1ee   : > { %v427_v33 = vmul.f32 %v425_v31, %v383_v11 }
 0x1f0   : > { %v432_v34 = vadd.f32 %v506_v32, %v427_v33 }
 0x1f2   : > { %433 = vst [vmem:[%s222_s28] sm:$0xf] %v432_v34 }
 0x1f3 PF: > { %s15_s18 = sadd.s32 1, %s515_s18  }
 0x1f4   : > { %p12_p4 = scmp.ge.s32.totalorder %s15_s18, 4  }
 0x1f6   :  { %14 = sbr.rel (!%p12_p4) target bundleno = 1 (0x1), region = 71 }

</bundles_post_ra>
